<compile_context>
chip_gen: v6e
topology: v6e:2x2x1
jax: 0.10.0
libtpu: 0.0.40
codegen_flags: <defaults>
</compile_context>

<pallas_src>
import jax
import jax.numpy as jnp
from jax.experimental import pallas as pl
from jax.experimental.pallas import tpu as pltpu


def _round_up(x, m):
    return (x + m - 1) // m * m


def _choose_tiling(B, batch_tile):
    """Pick (TB, B_pad): TB a multiple of 128, B_pad a multiple of TB.

    Aims for a grid of >= 2 steps whenever there is enough batch to split so
    both v7x TensorCores (dimension_semantics=("parallel",)) get work.
    """
    B128 = _round_up(max(B, 1), 128)
    if B128 <= 128:
        return 128, 128
    if B128 <= batch_tile:
        # Whole batch would fit in one max-size tile: split into two
        # lane-aligned tiles instead (megacore / 2-TC sharding).
        tb = _round_up((B128 + 1) // 2, 128)
        return tb, 2 * tb
    tb = batch_tile
    return tb, _round_up(B128, tb)


def _sigmoid(x):
    # sigmoid(x) = 0.5 * tanh(x/2) + 0.5 : one EUP op (tanh) instead of
    # exp + divide. Identical to jax.nn.sigmoid to within a couple ulps.
    return 0.5 * jnp.tanh(0.5 * x) + 0.5


def ncd_kernel(stu_ref, kd_ref, ed_ref,
               w1_ref, b1_ref, w2_ref, b2_ref, w3_ref, b3_ref,
               out_ref):
    """One batch tile, feature-first layout (batch along lanes).

    stu_ref : (K, TB)   sigmoid(student_emb) rows, gathered, feature-first
    kd_ref  : (K, TB)   sigmoid(k_difficulty) rows, gathered, feature-first
    ed_ref  : (1, TB)   sigmoid(e_discrimination) * 10, gathered
    w1_ref  : (L1, K)   b1_ref : (L1, 1)
    w2_ref  : (L2, L1)  b2_ref : (L2, 1)
    w3_ref  : (L2, 1)   b3_ref : (1, 1) in SMEM (scalar)
    out_ref : (1, TB)   lane-dense output row
    """
    # input_x = e_discrimination * (stu_emb - k_difficulty)
    x = ed_ref[...] * (stu_ref[...] - kd_ref[...])                 # (K, TB)

    # prednet_full1 + sigmoid (drop_1 identity in eval)
    h1 = _sigmoid(
        jnp.dot(w1_ref[...], x, preferred_element_type=jnp.float32)
        + b1_ref[...])                                             # (L1, TB)

    # prednet_full2 + sigmoid (drop_2 identity in eval)
    h2 = _sigmoid(
        jnp.dot(w2_ref[...], h1, preferred_element_type=jnp.float32)
        + b2_ref[...])                                             # (L2, TB)

    # prednet_full3 (out_features=1): VPU multiply + sublane (XLU) reduce,
    # not a degenerate 1-column MXU matmul. b3 is a scalar read from SMEM.
    logits = jnp.sum(h2 * w3_ref[...], axis=0, keepdims=True) + b3_ref[0, 0]
    out_ref[...] = _sigmoid(logits)                                # (1, TB)


def ncd_forward_pallas(stu_t, kd_t, ed_t, w1, b1c, w2, b2c, w3c, b3,
                       *, batch_tile):
    K, B_pad = stu_t.shape
    L1 = w1.shape[0]
    L2 = w2.shape[0]
    TB = batch_tile
    assert B_pad % TB == 0 and TB % 128 == 0

    # Scoped-VMEM limit sized for the tile: ~2-3 KiB of live f32 state per
    # batch row (double-buffered inputs + h1/h2 temporaries) plus fixed
    # overhead, with margin. Stays under v7x's 64 MiB physical VMEM at the
    # default 8192-row tile; capped well below v5e/v6e's 128 MiB.
    vmem_limit = int(min(120 * 2**20, max(32 * 2**20, 4 * 2**20 + 5 * 1024 * TB)))

    return pl.pallas_call(
        ncd_kernel,
        out_shape=jax.ShapeDtypeStruct((1, B_pad), jnp.float32),
        grid=(B_pad // TB,),
        in_specs=[
            # batch-tiled, lane-dense inputs
            pl.BlockSpec((K, TB), lambda i: (0, i)),
            pl.BlockSpec((K, TB), lambda i: (0, i)),
            pl.BlockSpec((1, TB), lambda i: (0, i)),
            # weights / biases: constant index_map -> resident in VMEM
            pl.BlockSpec((L1, K), lambda i: (0, 0)),
            pl.BlockSpec((L1, 1), lambda i: (0, 0)),
            pl.BlockSpec((L2, L1), lambda i: (0, 0)),
            pl.BlockSpec((L2, 1), lambda i: (0, 0)),
            pl.BlockSpec((L2, 1), lambda i: (0, 0)),
            # b3 scalar: SMEM, whole (1,1) array
            pl.BlockSpec(memory_space=pltpu.MemorySpace.SMEM),
        ],
        out_specs=pl.BlockSpec((1, TB), lambda i: (0, i)),
        compiler_params=pltpu.CompilerParams(
            dimension_semantics=("parallel",),
            vmem_limit_bytes=vmem_limit),
    )(stu_t, kd_t, ed_t, w1, b1c, w2, b2c, w3c, b3)


def xavier_normal(key, shape):
    # nn.init.xavier_normal_ : std = sqrt(2 / (fan_in + fan_out))
    fan_out, fan_in = shape
    std = (2.0 / (fan_in + fan_out)) ** 0.5
    return (std * jax.random.normal(key, shape)).astype(jnp.float32)


class NCDParams:
    def __init__(self, key, student_n, exer_n, knowledge_n,
                 prednet_len1=128, prednet_len2=64):
        ks = jax.random.split(key, 9)
        K, L1, L2 = knowledge_n, prednet_len1, prednet_len2
        self.knowledge_n = K
        # Embedding tables (xavier_normal, as in the PyTorch __init__ loop)
        self.student_emb = xavier_normal(ks[0], (student_n, K))
        self.k_difficulty = xavier_normal(ks[1], (exer_n, K))
        self.e_discrimination = xavier_normal(ks[2], (exer_n, 1))
        # Linear weights in PyTorch (out_features, in_features) orientation --
        # exactly what the feature-first in-kernel matmuls use.
        self.w1 = xavier_normal(ks[3], (L1, K))
        self.w2 = xavier_normal(ks[4], (L2, L1))
        self.w3 = xavier_normal(ks[5], (1, L2))
        # Biases (PyTorch-default-style uniform), stored as columns for the
        # feature-first layout.
        self.b1 = (jax.random.uniform(ks[6], (L1, 1), minval=-1.0, maxval=1.0)
                   / jnp.sqrt(K)).astype(jnp.float32)
        self.b2 = (jax.random.uniform(ks[7], (L2, 1), minval=-1.0, maxval=1.0)
                   / jnp.sqrt(L1)).astype(jnp.float32)
        self.b3 = (jax.random.uniform(ks[8], (1, 1), minval=-1.0, maxval=1.0)
                   / jnp.sqrt(L2)).astype(jnp.float32)


def ncd_forward(params, stu_id, exer_id, kn_emb, *,
                batch_tile=8192, min_pallas_batch=512):
    # NOTE: kn_emb is accepted but unused, exactly matching the reference
    # PyTorch forward() (it never multiplies by kn_emb).
    B = int(stu_id.shape[0])

    # Small-B fast path: below ~one tile of rows the pallas_call fixed cost
    # plus the gather wrapper dominates, so use plain XLA.
    if B < min_pallas_batch:
        return ncd_forward_ref(params, stu_id, exer_id, kn_emb)

    K = params.knowledge_n
    TB, B_pad = _choose_tiling(B, batch_tile)
    pad = B_pad - B

    # Sigmoid once at table granularity (identical math to gather-then-sigmoid,
    # table << batch in the intended regime) and keep the tables feature-first,
    # so the batch gather lands directly in the (K, B_pad) layout the kernel
    # consumes. No concat / pad / transpose of the batch-sized activation:
    # only the fundamental gather-write + kernel-read HBM traffic remains.
    stu_tbl_t = jnp.transpose(jax.nn.sigmoid(params.student_emb))    # (K, Ns)
    kd_tbl_t = jnp.transpose(jax.nn.sigmoid(params.k_difficulty))    # (K, Ne)
    ed_tbl = (jax.nn.sigmoid(params.e_discrimination) * 10.0).reshape(-1)

    # Pad the (tiny) int32 index vectors instead of the activations.
    stu_id_p = jnp.pad(stu_id.astype(jnp.int32), (0, pad))
    exer_id_p = jnp.pad(exer_id.astype(jnp.int32), (0, pad))

    stu_t = jnp.take(stu_tbl_t, stu_id_p, axis=1)                    # (K, B_pad)
    kd_t = jnp.take(kd_tbl_t, exer_id_p, axis=1)                     # (K, B_pad)
    ed_t = jnp.take(ed_tbl, exer_id_p, axis=0).reshape(1, B_pad)     # (1, B_pad)

    out_row = ncd_forward_pallas(
        stu_t, kd_t, ed_t,
        params.w1, params.b1,
        params.w2, params.b2,
        jnp.transpose(params.w3),          # w3 as (L2, 1) column
        params.b3,
        batch_tile=TB)                     # (1, B_pad)

    return out_row[0, :B].reshape(B, 1)


def ncd_forward_ref(params, stu_id, exer_id, kn_emb):
    # Pure-JAX reference (feature-last, like the PyTorch module).
    del kn_emb
    stu = jax.nn.sigmoid(jnp.take(params.student_emb, stu_id, axis=0))
    kd = jax.nn.sigmoid(jnp.take(params.k_difficulty, exer_id, axis=0))
    ed = jax.nn.sigmoid(jnp.take(params.e_discrimination, exer_id, axis=0)) * 10.0
    x = ed * (stu - kd)
    h1 = jax.nn.sigmoid(x @ params.w1.T + params.b1.T)
    h2 = jax.nn.sigmoid(h1 @ params.w2.T + params.b2.T)
    return jax.nn.sigmoid(h2 @ params.w3.T + params.b3.T)


if __name__ == "__main__":
    key = jax.random.PRNGKey(0)
    pkey, ikey1, ikey2, ikey3, ikey4 = jax.random.split(key, 5)

    student_n, exer_n, knowledge_n = 20, 30, 32
    prednet_len1, prednet_len2 = 128, 64

    params = NCDParams(pkey, student_n, exer_n, knowledge_n,
                       prednet_len1, prednet_len2)

    # Case 1: tiny batch, forced through the Pallas kernel (single 128-row tile).
    B1 = 8
    stu_id = jax.random.randint(ikey1, (B1,), 0, student_n)
    exer_id = jax.random.randint(ikey2, (B1,), 0, exer_n)
    kn_emb = jnp.zeros((B1, knowledge_n), dtype=jnp.float32)  # unused by forward

    out = ncd_forward(params, stu_id, exer_id, kn_emb, min_pallas_batch=0)
    out = jax.block_until_ready(out)
    ref = ncd_forward_ref(params, stu_id, exer_id, kn_emb)
    assert out.shape == (B1, 1), out.shape
    assert jnp.allclose(out, ref, atol=1e-5, rtol=1e-4), (out, ref)

    # Case 2: batch that pads and splits into a 2-step grid (exercises index
    # padding + the megacore-friendly tiling heuristic).
    B2 = 300
    stu_id2 = jax.random.randint(ikey3, (B2,), 0, student_n)
    exer_id2 = jax.random.randint(ikey4, (B2,), 0, exer_n)
    kn_emb2 = jnp.zeros((B2, knowledge_n), dtype=jnp.float32)

    out2 = ncd_forward(params, stu_id2, exer_id2, kn_emb2, min_pallas_batch=0)
    out2 = jax.block_until_ready(out2)
    ref2 = ncd_forward_ref(params, stu_id2, exer_id2, kn_emb2)
    assert out2.shape == (B2, 1), out2.shape
    assert jnp.allclose(out2, ref2, atol=1e-5, rtol=1e-4), (out2, ref2)

    print("KERNEL_OK")
</pallas_src>

<mosaic_0001>
module attributes {stable_mosaic.version = 11 : i64} {
  func.func @ncd_kernel(%arg0: i32, %arg1: memref<32x128xf32, #tpu.memory_space<vmem>>, %arg2: memref<32x128xf32, #tpu.memory_space<vmem>>, %arg3: memref<1x128xf32, #tpu.memory_space<vmem>>, %arg4: memref<128x32xf32, #tpu.memory_space<vmem>>, %arg5: memref<128x1xf32, #tpu.memory_space<vmem>>, %arg6: memref<64x128xf32, #tpu.memory_space<vmem>>, %arg7: memref<64x1xf32, #tpu.memory_space<vmem>>, %arg8: memref<64x1xf32, #tpu.memory_space<vmem>>, %arg9: memref<1x1xf32, #tpu.memory_space<smem>>, %arg10: memref<1x128xf32, #tpu.memory_space<vmem>>) attributes {dimension_semantics = [#tpu.dimension_semantics<parallel>], iteration_bounds = array<i64: 1>, scalar_prefetch = 0 : i64, scratch_operands = 0 : i64, tpu.core_type = #tpu.core_type<tc>, window_params = [{transform_indices = @transform_0, window_bounds = array<i64: 32, 128>}, {transform_indices = @transform_1, window_bounds = array<i64: 32, 128>}, {transform_indices = @transform_2, window_bounds = array<i64: 1, 128>}, {pipeline_mode = #tpu.pipeline_mode<synchronous>, transform_indices = @transform_3, window_bounds = array<i64: 128, 32>}, {pipeline_mode = #tpu.pipeline_mode<synchronous>, transform_indices = @transform_4, window_bounds = array<i64: 128, 1>}, {pipeline_mode = #tpu.pipeline_mode<synchronous>, transform_indices = @transform_5, window_bounds = array<i64: 64, 128>}, {pipeline_mode = #tpu.pipeline_mode<synchronous>, transform_indices = @transform_6, window_bounds = array<i64: 64, 1>}, {pipeline_mode = #tpu.pipeline_mode<synchronous>, transform_indices = @transform_7, window_bounds = array<i64: 64, 1>}, {transform_indices = @transform_8, window_bounds = array<i64: 1, 1>}, {transform_indices = @transform_9, window_bounds = array<i64: 1, 128>}]} {
    %c0 = arith.constant 0 : index
    %c0_0 = arith.constant 0 : index
    %0 = vector.load %arg3[%c0, %c0_0] : memref<1x128xf32, #tpu.memory_space<vmem>>, vector<1x128xf32>
    %c0_1 = arith.constant 0 : index
    %c0_2 = arith.constant 0 : index
    %1 = vector.load %arg1[%c0_1, %c0_2] : memref<32x128xf32, #tpu.memory_space<vmem>>, vector<32x128xf32>
    %c0_3 = arith.constant 0 : index
    %c0_4 = arith.constant 0 : index
    %2 = vector.load %arg2[%c0_3, %c0_4] : memref<32x128xf32, #tpu.memory_space<vmem>>, vector<32x128xf32>
    %3 = arith.subf %1, %2 : vector<32x128xf32>
    %4 = vector.broadcast %0 : vector<1x128xf32> to vector<32x128xf32>
    %5 = arith.mulf %4, %3 : vector<32x128xf32>
    %c0_5 = arith.constant 0 : index
    %c0_6 = arith.constant 0 : index
    %6 = vector.load %arg4[%c0_5, %c0_6] : memref<128x32xf32, #tpu.memory_space<vmem>>, vector<128x32xf32>
    %cst = arith.constant dense<0.000000e+00> : vector<128x128xf32>
    %7 = tpu.matmul %6, %5, %cst {dimension_numbers = #tpu.dot_dimension_numbers<[1], [0], [0], [1], [0, 0, 1, 1], [], []>} : vector<128x32xf32>, vector<32x128xf32>, vector<128x128xf32> -> vector<128x128xf32>
    %c0_7 = arith.constant 0 : index
    %c0_8 = arith.constant 0 : index
    %8 = vector.load %arg5[%c0_7, %c0_8] : memref<128x1xf32, #tpu.memory_space<vmem>>, vector<128x1xf32>
    %9 = vector.broadcast %8 : vector<128x1xf32> to vector<128x128xf32>
    %10 = arith.addf %7, %9 : vector<128x128xf32>
    %cst_9 = arith.constant 5.000000e-01 : f32
    %11 = vector.broadcast %cst_9 : f32 to vector<128x128xf32>
    %12 = arith.mulf %11, %10 : vector<128x128xf32>
    %13 = math.tanh %12 : vector<128x128xf32>
    %cst_10 = arith.constant 5.000000e-01 : f32
    %14 = vector.broadcast %cst_10 : f32 to vector<128x128xf32>
    %15 = arith.mulf %14, %13 : vector<128x128xf32>
    %cst_11 = arith.constant 5.000000e-01 : f32
    %16 = vector.broadcast %cst_11 : f32 to vector<128x128xf32>
    %17 = arith.addf %15, %16 : vector<128x128xf32>
    %c0_12 = arith.constant 0 : index
    %c0_13 = arith.constant 0 : index
    %18 = vector.load %arg6[%c0_12, %c0_13] : memref<64x128xf32, #tpu.memory_space<vmem>>, vector<64x128xf32>
    %cst_14 = arith.constant dense<0.000000e+00> : vector<64x128xf32>
    %19 = tpu.matmul %18, %17, %cst_14 {dimension_numbers = #tpu.dot_dimension_numbers<[1], [0], [0], [1], [0, 0, 1, 1], [], []>} : vector<64x128xf32>, vector<128x128xf32>, vector<64x128xf32> -> vector<64x128xf32>
    %c0_15 = arith.constant 0 : index
    %c0_16 = arith.constant 0 : index
    %20 = vector.load %arg7[%c0_15, %c0_16] : memref<64x1xf32, #tpu.memory_space<vmem>>, vector<64x1xf32>
    %21 = vector.broadcast %20 : vector<64x1xf32> to vector<64x128xf32>
    %22 = arith.addf %19, %21 : vector<64x128xf32>
    %cst_17 = arith.constant 5.000000e-01 : f32
    %23 = vector.broadcast %cst_17 : f32 to vector<64x128xf32>
    %24 = arith.mulf %23, %22 : vector<64x128xf32>
    %25 = math.tanh %24 : vector<64x128xf32>
    %cst_18 = arith.constant 5.000000e-01 : f32
    %26 = vector.broadcast %cst_18 : f32 to vector<64x128xf32>
    %27 = arith.mulf %26, %25 : vector<64x128xf32>
    %cst_19 = arith.constant 5.000000e-01 : f32
    %28 = vector.broadcast %cst_19 : f32 to vector<64x128xf32>
    %29 = arith.addf %27, %28 : vector<64x128xf32>
    %c0_20 = arith.constant 0 : index
    %c0_21 = arith.constant 0 : index
    %30 = vector.load %arg8[%c0_20, %c0_21] : memref<64x1xf32, #tpu.memory_space<vmem>>, vector<64x1xf32>
    %31 = vector.broadcast %30 : vector<64x1xf32> to vector<64x128xf32>
    %32 = arith.mulf %29, %31 : vector<64x128xf32>
    %cst_22 = arith.constant dense<0.000000e+00> : vector<128xf32>
    %33 = vector.multi_reduction <add>, %32, %cst_22 [0] : vector<64x128xf32> to vector<128xf32>
    %34 = vector.shape_cast %33 : vector<128xf32> to vector<1x128xf32>
    %c0_23 = arith.constant 0 : index
    %c0_24 = arith.constant 0 : index
    %35 = memref.load %arg9[%c0_23, %c0_24] : memref<1x1xf32, #tpu.memory_space<smem>>
    %36 = vector.broadcast %35 : f32 to vector<1x128xf32>
    %37 = arith.addf %34, %36 : vector<1x128xf32>
    %cst_25 = arith.constant 5.000000e-01 : f32
    %38 = vector.broadcast %cst_25 : f32 to vector<1x128xf32>
    %39 = arith.mulf %38, %37 : vector<1x128xf32>
    %40 = math.tanh %39 : vector<1x128xf32>
    %cst_26 = arith.constant 5.000000e-01 : f32
    %41 = vector.broadcast %cst_26 : f32 to vector<1x128xf32>
    %42 = arith.mulf %41, %40 : vector<1x128xf32>
    %cst_27 = arith.constant 5.000000e-01 : f32
    %43 = vector.broadcast %cst_27 : f32 to vector<1x128xf32>
    %44 = arith.addf %42, %43 : vector<1x128xf32>
    %c0_28 = arith.constant 0 : index
    %c0_29 = arith.constant 0 : index
    %45 = vector.load %arg10[%c0_28, %c0_29] : memref<1x128xf32, #tpu.memory_space<vmem>>, vector<1x128xf32>
    tpu.vector_store %arg10[%c0_28, %c0_29], %44 {strides = array<i32>} : memref<1x128xf32, #tpu.memory_space<vmem>>, vector<1x128xf32>,
    return
  }
  func.func @transform_0(%arg0: i32) -> (i32, i32) {
    %c0_i32 = arith.constant 0 : i32
    %c0_i32_0 = arith.constant 0 : i32
    return %c0_i32, %arg0 : i32, i32
  }
  func.func @transform_1(%arg0: i32) -> (i32, i32) {
    %c0_i32 = arith.constant 0 : i32
    %c0_i32_0 = arith.constant 0 : i32
    return %c0_i32, %arg0 : i32, i32
  }
  func.func @transform_2(%arg0: i32) -> (i32, i32) {
    %c0_i32 = arith.constant 0 : i32
    %c0_i32_0 = arith.constant 0 : i32
    return %c0_i32, %arg0 : i32, i32
  }
  func.func @transform_3(%arg0: i32) -> (i32, i32) {
    %c0_i32 = arith.constant 0 : i32
    %c0_i32_0 = arith.constant 0 : i32
    %c0_i32_1 = arith.constant 0 : i32
    return %c0_i32, %c0_i32_0 : i32, i32
  }
  func.func @transform_4(%arg0: i32) -> (i32, i32) {
    %c0_i32 = arith.constant 0 : i32
    %c0_i32_0 = arith.constant 0 : i32
    %c0_i32_1 = arith.constant 0 : i32
    return %c0_i32, %c0_i32_0 : i32, i32
  }
  func.func @transform_5(%arg0: i32) -> (i32, i32) {
    %c0_i32 = arith.constant 0 : i32
    %c0_i32_0 = arith.constant 0 : i32
    %c0_i32_1 = arith.constant 0 : i32
    return %c0_i32, %c0_i32_0 : i32, i32
  }
  func.func @transform_6(%arg0: i32) -> (i32, i32) {
    %c0_i32 = arith.constant 0 : i32
    %c0_i32_0 = arith.constant 0 : i32
    %c0_i32_1 = arith.constant 0 : i32
    return %c0_i32, %c0_i32_0 : i32, i32
  }
  func.func @transform_7(%arg0: i32) -> (i32, i32) {
    %c0_i32 = arith.constant 0 : i32
    %c0_i32_0 = arith.constant 0 : i32
    %c0_i32_1 = arith.constant 0 : i32
    return %c0_i32, %c0_i32_0 : i32, i32
  }
  func.func @transform_8(%arg0: i32) -> (i32, i32) {
    %c0_i32 = arith.constant 0 : i32
    %c0_i32_0 = arith.constant 0 : i32
    %c0_i32_1 = arith.constant 0 : i32
    return %c0_i32, %c0_i32_0 : i32, i32
  }
  func.func @transform_9(%arg0: i32) -> (i32, i32) {
    %c0_i32 = arith.constant 0 : i32
    %c0_i32_0 = arith.constant 0 : i32
    return %c0_i32, %arg0 : i32, i32
  }
}

</mosaic_0001>

<bundles_post_ra>
// kernel: tpu_custom_call.1
= control target key start
LH: loop header
LB: loop body
LE: loop exit
PB: predicated region body
PF: predicated region fallthrough
CT: control target
= control target key end

     0   :  { %vm169_vm0 = vcmask 261120   ;;  %v956_v7 = vmov 0   ;;  %s1234_s0 = inlined_call_operand.vmem [shape: f32[32,128], index: 0, kind: input, shape index: {}]   ;;  %s1235_s1 = inlined_call_operand.vmem [shape: f32[32,128], index: 1, kind: input, shape index: {}]   ;;  %s1236_s2 = inlined_call_operand.vmem [shape: f32[1,128], index: 2, kind: input, shape index: {}]   ;;  %s1237_s3 = inlined_call_operand.vmem [shape: f32[128,32], index: 3, kind: input, shape index: {}]   ;;  %s1238_s4 = inlined_call_operand.vmem [shape: f32[128,1], index: 4, kind: input, shape index: {}]   ;;  %s1239_s5 = inlined_call_operand.vmem [shape: f32[64,128], index: 5, kind: input, shape index: {}]   ;;  %s1240_s6 = inlined_call_operand.vmem [shape: f32[64,1], index: 6, kind: input, shape index: {}]   ;;  %s1241_s7 = inlined_call_operand.vmem [shape: f32[64,1], index: 7, kind: input, shape index: {}]   ;;  %s1242_s8 = inlined_call_operand.<no memory space> [shape: f32[1,1], index: 8, kind: input, shape index: {}]   ;;  %s1243_s9 = inlined_call_operand.hbm [shape: f32[1,128], index: 9, kind: output, shape index: {}]  }
   0x1   :  { %v711_v0 = vld [vmem:[%s1236_s2] ss:$0 sm:$0xff]  ;;  %v38_v1 = vld [vmem:[%s1234_s0 + $0x18] sm:$0xff]  ;;  %v37_v4 = vld [vmem:[%s1234_s0 + $0x10] sm:$0xff]  ;;  %882 = vset.pattern.permute.xlu0 %v956_v7  ;;  %883 = vset.pattern.permute.xlu1 %v956_v7 }
   0x2   :  { %v42_v2 = vld [vmem:[%s1235_s1 + $0x18] sm:$0xff]  ;;  %v41_v5 = vld [vmem:[%s1235_s1 + $0x10] sm:$0xff]  ;;  %v36_v6 = vld [vmem:[%s1234_s0 + $0x8] sm:$0xff] }
   0x3   :  { %v46_v3 = vsub.f32 %v38_v1, %v42_v2  ;;  %v45_v8 = vsub.f32 %v37_v4, %v41_v5  ;;  %v40_v9 = vld [vmem:[%s1235_s1 + $0x8] sm:$0xff]  ;;  %v35_v10 = vld [vmem:[%s1234_s0] sm:$0xff]  ;;  %v88_v19 = vld [vmem:[%s1238_s4 + $0x78] sm:$0xff] }
   0x4   :  { %v39_v11 = vld [vmem:[%s1235_s1] sm:$0xff]  ;;  %v44_v13 = vsub.f32 %v36_v6, %v40_v9  ;;  %166 = vperm.xlu0 %882, %v88_v19   ;;  %v86_v20 = vld [vmem:[%s1238_s4 + $0x68] sm:$0xff]  ;;  %v87_v22 = vld [vmem:[%s1238_s4 + $0x70] sm:$0xff] }
   0x5   :  { %v56_v12 = vmul.f32 %v711_v0, %v46_v3  ;;  %v43_v14 = vsub.f32 %v35_v10, %v39_v11  ;;  %v57_v15 = vld [vmem:[%s1237_s3] sm:$0xff]  ;;  %v55_v16 = vmul.f32 %v711_v0, %v45_v8  ;;  %v58_v21 = vld [vmem:[%s1237_s3 + $0x8] sm:$0xff]  ;;  %156 = vperm.xlu1 %883, %v86_v20   ;;  %v59_v23 = vld [vmem:[%s1237_s3 + $0x10] sm:$0xff] }
   0x6   :  { %780 = vmatprep.mubr.msk.f32.mxu0 %vm169_vm0, %v57_v15  ;;  %v54_v17 = vmul.f32 %v711_v0, %v44_v13  ;;  %v85_v24 = vld [vmem:[%s1238_s4 + $0x60] sm:$0xff]  ;;  %v60_v25 = vld [vmem:[%s1237_s3 + $0x18] sm:$0xff]  ;;  %v83_v28 = vld [vmem:[%s1238_s4 + $0x50] sm:$0xff] }
   0x7   :  { %772 = vmatprep.subr.mxu0 %v56_v12  ;;  %v53_v18 = vmul.f32 %v711_v0, %v43_v14  ;;  %v84_v26 = vld [vmem:[%s1238_s4 + $0x58] sm:$0xff]  ;;  %v61_v27 = vld [vmem:[%s1237_s3 + $0x20] sm:$0xff]  ;;  %v62_v29 = vld [vmem:[%s1237_s3 + $0x28] sm:$0xff] }
   0x8   :  { %773 = vmatpush3.msra.mxu0 %v56_v12  ;;  %161 = vperm.xlu0 %882, %v87_v22   ;;  %v82_v30 = vld [vmem:[%s1238_s4 + $0x48] sm:$0xff]  ;;  %v63_v31 = vld [vmem:[%s1237_s3 + $0x30] sm:$0xff]  ;;  %v81_v32 = vld [vmem:[%s1238_s4 + $0x40] sm:$0xff] }
   0x9   :  { %774 = vmatprep.subr.mxu0 %v55_v16  ;;  %151 = vperm.xlu1 %883, %v85_v24  }
   0xa   :  { %775 = vmatpush3.msra.mxu0 %v55_v16 }
   0xb   :  { %776 = vmatprep.subr.mxu0 %v54_v17 }
   0xc   :  { %777 = vmatpush3.msra.mxu0 %v54_v17  ;;  %146 = vperm.xlu0 %882, %v84_v26  }
   0xd   :  { %778 = vmatprep.subr.mxu0 %v53_v18  ;;  %141 = vperm.xlu1 %883, %v83_v28  }
   0xe   :  { %779 = vmatpush3.msra.mxu0 %v53_v18 }
   0xf   :  { %781 = vmatmul.mubr.msk.f32.vlgmr.msra.gmra.mxu0 %vm169_vm0, %v58_v21 }
  0x10   :  { %783 = vmatprep.mubr.msk.f32.mxu0 %vm169_vm0, %v59_v23 }
  0x13   :  { %784 = vmatmul.mubr.msk.f32.gmra.mxu0 %vm169_vm0, %v60_v25 }
  0x14   :  { %786 = vmatprep.mubr.msk.f32.mxu0 %vm169_vm0, %v61_v27 }
  0x15   :  { %15 = vsyncpa [#allocation4], 0  ;;  %136 = vperm.xlu0 %882, %v82_v30   ;;  %v64_v33 = vld [vmem:[%s1237_s3 + $0x38] sm:$0xff]  ;;  %131 = vperm.xlu1 %883, %v81_v32   ;;  %v65_v35 = vld [vmem:[%s1237_s3 + $0x40] sm:$0xff]  ;;  %s957_s14 = smov [#allocation3]  }
  0x16   :  { %v80_v34 = vld [vmem:[%s1238_s4 + $0x38] sm:$0xff]  ;;  %v79_v36 = vld [vmem:[%s1238_s4 + $0x30] sm:$0xff]  ;;  %v66_v37 = vld [vmem:[%s1237_s3 + $0x48] sm:$0xff]  ;;  %s703_s15 = sshll.u32 %s957_s14, 4  ;;  %s704_s15 = int_to_ptr.vmem [resolvable:$true] %s703_s15 }
  0x17   :  { %787 = vmatmul.mubr.msk.f32.gmra.mxu0 %vm169_vm0, %v62_v29  ;;  %v78_v38 = vld [vmem:[%s1238_s4 + $0x28] sm:$0xff]  ;;  %v67_v39 = vld [vmem:[%s1237_s3 + $0x50] sm:$0xff]  ;;  %v77_v40 = vld [vmem:[%s1238_s4 + $0x20] sm:$0xff]  ;;  %s934_s16 = scalar_lea.vmem %s704_s15, 16  ;;  %p939_p1 = scmp.lt.s32.totalorder %s704_s15, %s704_s15 }
  0x18   :  { %789 = vmatprep.mubr.msk.f32.mxu0 %vm169_vm0, %v63_v31  ;;  %v68_v41 = vld [vmem:[%s1237_s3 + $0x58] sm:$0xff]  ;;  %v69_v43 = vld [vmem:[%s1237_s3 + $0x60] sm:$0xff]  ;;  %v75_v44 = vld [vmem:[%s1238_s4 + $0x10] sm:$0xff]  ;;  %p935_p0 = scmp.ne.s32.totalorder %s704_s15, %s934_s16 }
  0x19   :  { %126 = vperm.xlu0 %882, %v80_v34   ;;  %121 = vperm.xlu1 %883, %v79_v36   ;;  %v76_v42 = vld [vmem:[%s1238_s4 + $0x18] sm:$0xff]  ;;  %v70_v45 = vld [vmem:[%s1237_s3 + $0x68] sm:$0xff]  ;;  %v71_v47 = vld [vmem:[%s1237_s3 + $0x70] sm:$0xff] }
  0x1a   :  { %v74_v46 = vld [vmem:[%s1238_s4 + $0x8] sm:$0xff]  ;;  %v73_v48 = vld [vmem:[%s1238_s4] sm:$0xff]  ;;  %v72_v49 = vld [vmem:[%s1237_s3 + $0x78] sm:$0xff] }
  0x1b   :  { %790 = vmatmul.mubr.msk.f32.gmra.mxu0 %vm169_vm0, %v64_v33  ;;  %v435_v50 = vld [vmem:[%s1240_s6] sm:$0xff]  ;;  %v436_v51 = vld [vmem:[%s1240_s6 + $0x8] sm:$0xff]  ;;  %v437_v52 = vld [vmem:[%s1240_s6 + $0x10] sm:$0xff] }
  0x1c   :  { %792 = vmatprep.mubr.msk.f32.mxu0 %vm169_vm0, %v65_v35  ;;  %v438_v53 = vld [vmem:[%s1240_s6 + $0x18] sm:$0xff]  ;;  %v439_v54 = vld [vmem:[%s1240_s6 + $0x20] sm:$0xff]  ;;  %v440_v55 = vld [vmem:[%s1240_s6 + $0x28] sm:$0xff] }
  0x1d   :  { %116 = vperm.xlu0 %882, %v78_v38   ;;  %111 = vperm.xlu1 %883, %v77_v40   ;;  %v441_v56 = vld [vmem:[%s1240_s6 + $0x30] sm:$0xff]  ;;  %v442_v57 = vld [vmem:[%s1240_s6 + $0x38] sm:$0xff]  ;;  %v620_v58 = vld [vmem:[%s1241_s7] sm:$0xff]  ;;  %s938_s6 = scalar_lea.vmem %s704_s15, 32 }
  0x1e   :  { %v621_v59 = vld [vmem:[%s1241_s7 + $0x8] sm:$0xff]  ;;  %v622_v60 = vld [vmem:[%s1241_s7 + $0x10] sm:$0xff]  ;;  %v623_v61 = vld [vmem:[%s1241_s7 + $0x18] sm:$0xff]  ;;  %p940_p2 = scmp.lt.s32.totalorder %s938_s6, %s934_s16 }
  0x1f   :  { %793 = vmatmul.mubr.msk.f32.gmra.mxu0 %vm169_vm0, %v66_v37  ;;  %v624_v62 = vld [vmem:[%s1241_s7 + $0x20] sm:$0xff]  ;;  %v625_v63 = vld [vmem:[%s1241_s7 + $0x28] sm:$0xff]  ;;  %v626_v0 = vld [vmem:[%s1241_s7 + $0x30] sm:$0xff] }
  0x20   :  { %795 = vmatprep.mubr.msk.f32.mxu0 %vm169_vm0, %v67_v39  ;;  %v627_v1 = vld [vmem:[%s1241_s7 + $0x38] sm:$0xff]  ;;  %v427_v2 = vld [vmem:[%s1239_s5] sm:$0xff]  ;;  %v429_v3 = vld [vmem:[%s1239_s5 + $0x10] sm:$0xff]  ;;  %p941_p3 = por %p940_p2, %p939_p1 }
  0x21   :  { %106 = vperm.xlu0 %882, %v76_v42   ;;  %101 = vperm.xlu1 %883, %v75_v44  }
  0x22   :  { %839 = vmatprep.mubr.f32.mxu1 %v429_v3  ;;  %p942_p4 = pnand %p941_p3, %p935_p0 }
  0x23   :  { %796 = vmatmul.mubr.msk.f32.gmra.mxu0 %vm169_vm0, %v68_v41 }
  0x24   :  { %798 = vmatprep.mubr.msk.f32.mxu0 %vm169_vm0, %v69_v43 }
  0x25   :  { %96 = vperm.xlu0 %882, %v74_v46   ;;  %91 = vperm.xlu1 %883, %v73_v48  }
  0x27   :  { %799 = vmatmul.mubr.msk.f32.gmra.mxu0 %vm169_vm0, %v70_v45 }
  0x28   :  { %801 = vmatprep.mubr.msk.f32.mxu0 %vm169_vm0, %v71_v47 }
  0x29   :  { %445 = vperm.xlu0 %882, %v435_v50   ;;  %450 = vperm.xlu1 %883, %v436_v51  }
  0x2b   :  { %802 = vmatmul.mubr.msk.f32.gmra.mxu0 %vm169_vm0, %v72_v49 }
  0x2c   :  { %836 = vmatprep.mubr.f32.mxu0 %v427_v2 }
  0x2d   :  { %455 = vperm.xlu0 %882, %v437_v52   ;;  %460 = vperm.xlu1 %883, %v438_v53  }
  0x31   :  { %465 = vperm.xlu0 %882, %v439_v54   ;;  %470 = vperm.xlu1 %883, %v440_v55  }
  0x35   :  { %475 = vperm.xlu0 %882, %v441_v56   ;;  %480 = vperm.xlu1 %883, %v442_v57  }
  0x39   :  { %630 = vperm.xlu0 %882, %v620_v58   ;;  %635 = vperm.xlu1 %883, %v621_v59  }
  0x3d   :  { %640 = vperm.xlu0 %882, %v622_v60   ;;  %645 = vperm.xlu1 %883, %v623_v61  }
  0x41   :  { %650 = vperm.xlu0 %882, %v624_v62   ;;  %655 = vperm.xlu1 %883, %v625_v63  }
  0x45   :  { %660 = vperm.xlu0 %882, %v626_v0   ;;  %665 = vperm.xlu1 %883, %v627_v1  }
  0x7f   :  { %v167_v7 = vpop.permute.xlu0 %166 }
  0x80   :  { %v157_v9 = vpop.permute.xlu1 %156 }
  0x83   :  { %v162_v12 = vpop.permute.xlu0 %161 }
  0x84   :  { %v152_v14 = vpop.permute.xlu1 %151 }
  0x87   :  { %v147_v17 = vpop.permute.xlu0 %146 }
  0x88   :  { %v142_v19 = vpop.permute.xlu1 %141 }
  0x90   :  { %v137_v22 = vpop.permute.xlu0 %136  ;;  %v132_v24 = vpop.permute.xlu1 %131 }
  0x94   :  { %v127_v30 = vpop.permute.xlu0 %126  ;;  %v122_v35 = vpop.permute.xlu1 %121 }
  0x98   :  { %v117_v42 = vpop.permute.xlu0 %116  ;;  %v112_v45 = vpop.permute.xlu1 %111 }
  0x9c   :  { %v107_v50 = vpop.permute.xlu0 %106  ;;  %v102_v53 = vpop.permute.xlu1 %101 }
  0xa0   :  { %v97_v61 = vpop.permute.xlu0 %96 }
  0xcf   :  { %v1201_v4 = vpop.f32.mrf.mxu0 }
  0xd0   :  { %v290_v2 = vadd.f32 %v1201_v4, %v97_v61 }
  0xd1   :  { %v1203_v5 = vpop.f32.mrf.mxu0 }
  0xd3   :  { %v785_v6 = vpop.f32.mrf.mxu0 }
  0xd4   :  { %v300_v56 = vadd.f32 %v785_v6, %v107_v50 }
  0xd5   :  { %v1205_v8 = vpop.f32.mrf.mxu0 }
  0xd6   :  { %v295_v62 = vadd.f32 %v1205_v8, %v102_v53  ;;  %v366_v3 = vmul.f32 0.5, %v300_v56  ;;  %v430_v53 = vld [vmem:[%s1239_s5 + $0x18] sm:$0xff]  ;;  %v433_v56 = vld [vmem:[%s1239_s5 + $0x30] sm:$0xff] }
  0xd7   :  { %v788_v10 = vpop.f32.mrf.mxu0 }
  0xd8   :  { %v310_v51 = vadd.f32 %v788_v10, %v117_v42 }
  0xd9   :  { %v304_v11 = vpop.f32.mrf.mxu0 }
  0xda   :  { %v305_v54 = vadd.f32 %v304_v11, %v112_v45  ;;  %v368_v58 = vmul.f32 0.5, %v310_v51 }
  0xdb   :  { %v791_v13 = vpop.f32.mrf.mxu0 }
  0xdc   :  { %v320_v46 = vadd.f32 %v791_v13, %v127_v30  ;;  %v367_v63 = vmul.f32 0.5, %v305_v54  ;;  %v365_v13 = vmul.f32 0.5, %v295_v62  ;;  %v431_v54 = vld [vmem:[%s1239_s5 + $0x20] sm:$0xff] }
  0xdd   :  { %v314_v15 = vpop.f32.mrf.mxu0 }
  0xde   :  { %v315_v48 = vadd.f32 %v314_v15, %v122_v35  ;;  %v370_v52 = vmul.f32 0.5, %v320_v46 }
  0xdf   :  { %v794_v16 = vpop.f32.mrf.mxu0 }
  0xe0   :  { %v330_v39 = vadd.f32 %v794_v16, %v137_v22  ;;  %v369_v55 = vmul.f32 0.5, %v315_v48  ;;  %v364_v16 = vmul.f32 0.5, %v290_v2 }
  0xe1   :  { %v324_v18 = vpop.f32.mrf.mxu0 }
  0xe2   :  { %v325_v43 = vadd.f32 %v324_v18, %v132_v24  ;;  %v372_v47 = vmul.f32 0.5, %v330_v39 }
  0xe3   :  { %v797_v20 = vpop.f32.mrf.mxu0 }
  0xe4   :  { %v340_v31 = vadd.f32 %v797_v20, %v147_v17  ;;  %v371_v49 = vmul.f32 0.5, %v325_v43 }
  0xe5   :  { %v334_v21 = vpop.f32.mrf.mxu0 }
  0xe6   :  { %v335_v36 = vadd.f32 %v334_v21, %v142_v19  ;;  %v374_v40 = vmul.f32 0.5, %v340_v31 }
  0xe7   :  { %v800_v23 = vpop.f32.mrf.mxu0 }
  0xe8   :  { %v350_v25 = vadd.f32 %v800_v23, %v157_v9  ;;  %v373_v44 = vmul.f32 0.5, %v335_v36 }
  0xe9   :  { %v344_v26 = vpop.f32.mrf.mxu0 }
  0xea   :  { %v376_v27 = vmul.f32 0.5, %v350_v25  ;;  %v345_v28 = vadd.f32 %v344_v26, %v152_v14 }
  0xeb   :  { %v803_v29 = vpop.f32.mrf.mxu0 }
  0xec   :  { %v360_v32 = vadd.f32 %v803_v29, %v167_v7  ;;  %v375_v33 = vmul.f32 0.5, %v345_v28  ;;  %884 = vtanh.f32 %v376_v27  ;;  %v92_v7 = vpop.permute.xlu1 %91 }
  0xed   :  { %v354_v34 = vpop.f32.mrf.mxu0 }
  0xee   :  { %v378_v37 = vmul.f32 0.5, %v360_v32  ;;  %v355_v38 = vadd.f32 %v354_v34, %v162_v12  ;;  %v285_v12 = vadd.f32 %v1203_v5, %v92_v7 }
  0xf0   :  { %886 = vtanh.f32 %v378_v37  ;;  %v377_v41 = vmul.f32 0.5, %v355_v38  ;;  %v363_v19 = vmul.f32 0.5, %v285_v12 }
  0xf1   :  { %888 = vtanh.f32 %v375_v33 }
  0xf2   :  { %890 = vtanh.f32 %v377_v41 }
  0xf3   :  { %892 = vtanh.f32 %v374_v40 }
  0xf4   :  { %894 = vtanh.f32 %v373_v44 }
  0xf5   :  { %896 = vtanh.f32 %v372_v47 }
  0xf6   :  { %898 = vtanh.f32 %v371_v49 }
  0xf7   :  { %900 = vtanh.f32 %v370_v52  ;;  %v428_v52 = vld [vmem:[%s1239_s5 + $0x8] sm:$0xff] }
  0xf8   :  { %902 = vtanh.f32 %v369_v55  ;;  %v432_v55 = vld [vmem:[%s1239_s5 + $0x28] sm:$0xff] }
  0xf9   :  { %v885_v57 = vpop.eup %884  ;;  %904 = vtanh.f32 %v368_v58  ;;  %v451_v58 = vpop.permute.xlu1 %450 }
  0xfa   :  { %v408_v9 = vmul.f32 0.5, %v885_v57  ;;  %906 = vtanh.f32 %v367_v63  ;;  %v434_v57 = vld [vmem:[%s1239_s5 + $0x38] sm:$0xff] }
  0xfb   :  { %908 = vtanh.f32 %v366_v3 }
  0xfc   :  { %v424_v17 = vadd.f32 0.5, %v408_v9  ;;  %910 = vtanh.f32 %v365_v13 }
  0xfd   :  { %v887_v59 = vpop.eup %886  ;;  %912 = vtanh.f32 %v364_v16 }
  0xfe   :  { %v889_v60 = vpop.eup %888  ;;  %v410_v0 = vmul.f32 0.5, %v887_v59  ;;  %914 = vtanh.f32 %v363_v19  ;;  %v446_v59 = vpop.permute.xlu0 %445 }
  0xff   :  { %v891_v1 = vpop.eup %890  ;;  %v407_v14 = vmul.f32 0.5, %v889_v60  ;;  %v461_v60 = vpop.permute.xlu1 %460 }
 0x100   :  { %v426_v10 = vadd.f32 0.5, %v410_v0  ;;  %v409_v6 = vmul.f32 0.5, %v891_v1  ;;  %v893_v11 = vpop.eup %892 }
 0x101   :  { %v895_v8 = vpop.eup %894  ;;  %v406_v4 = vmul.f32 0.5, %v893_v11  ;;  %v423_v20 = vadd.f32 0.5, %v407_v14 }
 0x102   :  { %v425_v15 = vadd.f32 0.5, %v409_v6  ;;  %804 = vmatprep.subr.mxu0 %v426_v10  ;;  %848 = vmatprep.subr.mxu1 %v426_v10  ;;  %v897_v18 = vpop.eup %896  ;;  %v405_v5 = vmul.f32 0.5, %v895_v8  ;;  %v456_v61 = vpop.permute.xlu0 %455 }
 0x103   :  { %805 = vmatpush3.msra.mxu0 %v426_v10  ;;  %864 = vmatpush3.msra.mxu1 %v426_v10  ;;  %v899_v21 = vpop.eup %898  ;;  %v404_v22 = vmul.f32 0.5, %v897_v18  ;;  %v422_v23 = vadd.f32 0.5, %v406_v4  ;;  %v471_v0 = vpop.permute.xlu1 %470 }
 0x104   :  { %806 = vmatprep.subr.mxu0 %v425_v15  ;;  %849 = vmatprep.subr.mxu1 %v425_v15  ;;  %v901_v24 = vpop.eup %900  ;;  %v403_v25 = vmul.f32 0.5, %v899_v21  ;;  %v421_v26 = vadd.f32 0.5, %v405_v5 }
 0x105   :  { %807 = vmatpush3.msra.mxu0 %v425_v15  ;;  %865 = vmatpush3.msra.mxu1 %v425_v15  ;;  %v903_v27 = vpop.eup %902  ;;  %v402_v28 = vmul.f32 0.5, %v901_v24  ;;  %v420_v29 = vadd.f32 0.5, %v404_v22 }
 0x106   :  { %808 = vmatprep.subr.mxu0 %v424_v17  ;;  %850 = vmatprep.subr.mxu1 %v424_v17  ;;  %v905_v30 = vpop.eup %904  ;;  %v401_v31 = vmul.f32 0.5, %v903_v27  ;;  %v419_v32 = vadd.f32 0.5, %v403_v25  ;;  %v466_v12 = vpop.permute.xlu0 %465 }
 0x107   :  { %809 = vmatpush3.msra.mxu0 %v424_v17  ;;  %866 = vmatpush3.msra.mxu1 %v424_v17  ;;  %v907_v33 = vpop.eup %906  ;;  %v400_v34 = vmul.f32 0.5, %v905_v30  ;;  %v418_v35 = vadd.f32 0.5, %v402_v28  ;;  %v481_v18 = vpop.permute.xlu1 %480 }
 0x108   :  { %810 = vmatprep.subr.mxu0 %v423_v20  ;;  %851 = vmatprep.subr.mxu1 %v423_v20  ;;  %v909_v36 = vpop.eup %908  ;;  %v399_v37 = vmul.f32 0.5, %v907_v33  ;;  %v417_v38 = vadd.f32 0.5, %v401_v31 }
 0x109   :  { %811 = vmatpush3.msra.mxu0 %v423_v20  ;;  %867 = vmatpush3.msra.mxu1 %v423_v20  ;;  %v911_v39 = vpop.eup %910  ;;  %v398_v40 = vmul.f32 0.5, %v909_v36  ;;  %v416_v41 = vadd.f32 0.5, %v400_v34 }
 0x10a   :  { %812 = vmatprep.subr.mxu0 %v422_v23  ;;  %852 = vmatprep.subr.mxu1 %v422_v23  ;;  %v913_v42 = vpop.eup %912  ;;  %v397_v43 = vmul.f32 0.5, %v911_v39  ;;  %v415_v44 = vadd.f32 0.5, %v399_v37  ;;  %v476_v21 = vpop.permute.xlu0 %475 }
 0x10b   :  { %813 = vmatpush3.msra.mxu0 %v422_v23  ;;  %868 = vmatpush3.msra.mxu1 %v422_v23  ;;  %v915_v45 = vpop.eup %914  ;;  %v396_v46 = vmul.f32 0.5, %v913_v42  ;;  %v414_v47 = vadd.f32 0.5, %v398_v40  ;;  %v636_v28 = vpop.permute.xlu1 %635 }
 0x10c   :  { %814 = vmatprep.subr.mxu0 %v421_v26  ;;  %853 = vmatprep.subr.mxu1 %v421_v26  ;;  %v395_v48 = vmul.f32 0.5, %v915_v45  ;;  %v413_v49 = vadd.f32 0.5, %v397_v43 }
 0x10d   :  { %815 = vmatpush3.msra.mxu0 %v421_v26  ;;  %869 = vmatpush3.msra.mxu1 %v421_v26  ;;  %v412_v50 = vadd.f32 0.5, %v396_v46 }
 0x10e   :  { %816 = vmatprep.subr.mxu0 %v420_v29  ;;  %854 = vmatprep.subr.mxu1 %v420_v29  ;;  %v411_v51 = vadd.f32 0.5, %v395_v48  ;;  %v631_v26 = vpop.permute.xlu0 %630 }
 0x10f   :  { %817 = vmatpush3.msra.mxu0 %v420_v29  ;;  %870 = vmatpush3.msra.mxu1 %v420_v29 }
 0x110   :  { %818 = vmatprep.subr.mxu0 %v419_v32  ;;  %855 = vmatprep.subr.mxu1 %v419_v32 }
 0x111   :  { %819 = vmatpush3.msra.mxu0 %v419_v32  ;;  %871 = vmatpush3.msra.mxu1 %v419_v32 }
 0x112   :  { %820 = vmatprep.subr.mxu0 %v418_v35  ;;  %856 = vmatprep.subr.mxu1 %v418_v35  ;;  %v641_v37 = vpop.permute.xlu0 %640 }
 0x113   :  { %821 = vmatpush3.msra.mxu0 %v418_v35  ;;  %872 = vmatpush3.msra.mxu1 %v418_v35 }
 0x114   :  { %822 = vmatprep.subr.mxu0 %v417_v38  ;;  %857 = vmatprep.subr.mxu1 %v417_v38 }
 0x115   :  { %823 = vmatpush3.msra.mxu0 %v417_v38  ;;  %873 = vmatpush3.msra.mxu1 %v417_v38 }
 0x116   :  { %824 = vmatprep.subr.mxu0 %v416_v41  ;;  %858 = vmatprep.subr.mxu1 %v416_v41 }
 0x117   :  { %825 = vmatpush3.msra.mxu0 %v416_v41  ;;  %874 = vmatpush3.msra.mxu1 %v416_v41  ;;  %v646_v41 = vpop.permute.xlu1 %645 }
 0x118   :  { %826 = vmatprep.subr.mxu0 %v415_v44  ;;  %859 = vmatprep.subr.mxu1 %v415_v44 }
 0x119   :  { %827 = vmatpush3.msra.mxu0 %v415_v44  ;;  %875 = vmatpush3.msra.mxu1 %v415_v44 }
 0x11a   :  { %828 = vmatprep.subr.mxu0 %v414_v47  ;;  %860 = vmatprep.subr.mxu1 %v414_v47 }
 0x11b   :  { %829 = vmatpush3.msra.mxu0 %v414_v47  ;;  %876 = vmatpush3.msra.mxu1 %v414_v47 }
 0x11c   :  { %830 = vmatprep.subr.mxu0 %v413_v49  ;;  %861 = vmatprep.subr.mxu1 %v413_v49 }
 0x11d   :  { %831 = vmatpush3.msra.mxu0 %v413_v49  ;;  %877 = vmatpush3.msra.mxu1 %v413_v49 }
 0x11e   :  { %832 = vmatprep.subr.mxu0 %v412_v50  ;;  %862 = vmatprep.subr.mxu1 %v412_v50 }
 0x11f   :  { %833 = vmatpush3.msra.mxu0 %v412_v50  ;;  %878 = vmatpush3.msra.mxu1 %v412_v50 }
 0x120   :  { %834 = vmatprep.subr.mxu0 %v411_v51  ;;  %863 = vmatprep.subr.mxu1 %v411_v51 }
 0x121   :  { %835 = vmatpush3.msra.mxu0 %v411_v51  ;;  %879 = vmatpush3.msra.mxu1 %v411_v51 }
 0x122   :  { %837 = vmatmul.mubr.f32.vlgmr.msra.gmra.mxu0 %v428_v52  ;;  %840 = vmatmul.mubr.f32.vlgmr.msra.gmra.mxu1 %v430_v53  ;;  %v651_v53 = vpop.permute.xlu0 %650 }
 0x123   :  { %842 = vmatprep.mubr.f32.mxu1 %v431_v54 }
 0x126   :  { %843 = vmatmul.mubr.f32.gmra.mxu1 %v432_v55 }
 0x127   :  { %845 = vmatprep.mubr.f32.mxu1 %v433_v56 }
 0x12a   :  { %846 = vmatmul.mubr.f32.gmra.mxu1 %v434_v57 }
 0x1e2   :  { %v838_v62 = vpop.f32.mrf.mxu0  ;;  %v841_v63 = vpop.f32.mrf.mxu1 }
 0x1e3   :  { %v555_v1 = vadd.f32 %v838_v62, %v451_v58  ;;  %v565_v2 = vadd.f32 %v841_v63, %v461_v60 }
 0x1e4   :  { %v549_v3 = vpop.f32.mrf.mxu0  ;;  %v559_v7 = vpop.f32.mrf.mxu1 }
 0x1e5   :  { %v589_v9 = vmul.f32 0.5, %v555_v1  ;;  %v591_v10 = vmul.f32 0.5, %v565_v2  ;;  %v550_v6 = vadd.f32 %v549_v3, %v446_v59  ;;  %v560_v11 = vadd.f32 %v559_v7, %v456_v61  ;;  %v656_v59 = vpop.permute.xlu1 %655  ;;  %v661_v2 = vpop.permute.xlu0 %660 }
 0x1e6   :  { %v844_v13 = vpop.f32.mrf.mxu1 }
 0x1e7   :  { %916 = vtanh.f32 %v589_v9  ;;  %v588_v14 = vmul.f32 0.5, %v550_v6  ;;  %v590_v15 = vmul.f32 0.5, %v560_v11  ;;  %v575_v8 = vadd.f32 %v844_v13, %v471_v0 }
 0x1e8   :  { %918 = vtanh.f32 %v591_v10  ;;  %v569_v16 = vpop.f32.mrf.mxu1 }
 0x1e9   :  { %920 = vtanh.f32 %v588_v14  ;;  %v593_v4 = vmul.f32 0.5, %v575_v8  ;;  %v570_v17 = vadd.f32 %v569_v16, %v466_v12  ;;  %v666_v9 = vpop.permute.xlu1 %665  ;;  %v690_v16 = vstv %s1242_s8 }
 0x1ea   :  { %922 = vtanh.f32 %v590_v15  ;;  %v847_v19 = vpop.f32.mrf.mxu1 }
 0x1eb   :  { %924 = vtanh.f32 %v593_v4  ;;  %v592_v5 = vmul.f32 0.5, %v570_v17  ;;  %v585_v20 = vadd.f32 %v847_v19, %v481_v18 }
 0x1ec   :  { %v579_v22 = vpop.f32.mrf.mxu1 }
 0x1ed   :  { %926 = vtanh.f32 %v592_v5  ;;  %v595_v23 = vmul.f32 0.5, %v585_v20  ;;  %v580_v24 = vadd.f32 %v579_v22, %v476_v21 }
 0x1ef   :  { %928 = vtanh.f32 %v595_v23  ;;  %v594_v25 = vmul.f32 0.5, %v580_v24 }
 0x1f1   :  { %930 = vtanh.f32 %v594_v25 }
 0x1f4   :  { %v917_v27 = vpop.eup %916 }
 0x1f5   :  { %v919_v29 = vpop.eup %918  ;;  %v605_v30 = vmul.f32 0.5, %v917_v27 }
 0x1f6   :  { %v921_v31 = vpop.eup %920  ;;  %v607_v32 = vmul.f32 0.5, %v919_v29 }
 0x1f7   :  { %v923_v33 = vpop.eup %922  ;;  %v613_v34 = vadd.f32 0.5, %v605_v30  ;;  %v604_v35 = vmul.f32 0.5, %v921_v31 }
 0x1f8   :  { %v925_v36 = vpop.eup %924  ;;  %v606_v38 = vmul.f32 0.5, %v923_v33  ;;  %v615_v42 = vadd.f32 0.5, %v607_v32 }
 0x1f9   :  { %v612_v39 = vadd.f32 0.5, %v604_v35  ;;  %v669_v44 = vmul.f32 %v636_v28, %v613_v34  ;;  %v609_v46 = vmul.f32 0.5, %v925_v36 }
 0x1fa   :  { %v927_v40 = vpop.eup %926  ;;  %v614_v43 = vadd.f32 0.5, %v606_v38  ;;  %v671_v54 = vmul.f32 %v646_v41, %v615_v42 }
 0x1fb   :  { %v668_v45 = vmul.f32 %v631_v26, %v612_v39  ;;  %v608_v47 = vmul.f32 0.5, %v927_v40  ;;  %v617_v56 = vadd.f32 0.5, %v609_v46 }
 0x1fc   :  { %v929_v48 = vpop.eup %928  ;;  %v670_v50 = vmul.f32 %v641_v37, %v614_v43 }
 0x1fd   :  { %v676_v49 = vadd.f32 %v669_v44, %v668_v45  ;;  %v616_v51 = vadd.f32 0.5, %v608_v47  ;;  %v611_v57 = vmul.f32 0.5, %v929_v48  ;;  %v673_v63 = vmul.f32 %v656_v59, %v617_v56 }
 0x1fe   :  { %v931_v52 = vpop.eup %930 }
 0x1ff   :  { %v677_v55 = vadd.f32 %v676_v49, %v670_v50  ;;  %v610_v58 = vmul.f32 0.5, %v931_v52  ;;  %v672_v60 = vmul.f32 %v651_v53, %v616_v51  ;;  %v619_v1 = vadd.f32 0.5, %v611_v57 }
 0x201   :  { %v678_v61 = vadd.f32 %v677_v55, %v671_v54  ;;  %v618_v62 = vadd.f32 0.5, %v610_v58  ;;  %v675_v10 = vmul.f32 %v666_v9, %v619_v1 }
 0x203   :  { %v679_v0 = vadd.f32 %v678_v61, %v672_v60  ;;  %v674_v3 = vmul.f32 %v661_v2, %v618_v62 }
 0x205   :  { %v680_v7 = vadd.f32 %v679_v0, %v673_v63 }
 0x207   :  { %v681_v6 = vadd.f32 %v680_v7, %v674_v3 }
 0x209   :  { %v682_v11 = vadd.f32 %v681_v6, %v675_v10 }
 0x20b   :  { %v683_v12 = vrot.slane %v682_v11, 4 }
 0x20d   :  { %v684_v13 = vadd.f32 %v683_v12, %v682_v11 }
 0x20f   :  { %v685_v14 = vrot.slane %v684_v13, 2 }
 0x211   :  { %v686_v15 = vadd.f32 %v685_v14, %v684_v13 }
 0x213   :  { %v687_v8 = vrot.slane %v686_v15, 1 }
 0x215   :  { %v688_v4 = vadd.f32 %v687_v8, %v686_v15 }
 0x217   :  { %v691_v17 = vadd.f32 %v690_v16, %v688_v4 }
 0x219   :  { %v692_v18 = vmul.f32 0.5, %v691_v17 }
 0x21b   :  { %932 = vtanh.f32 %v692_v18 }
 0x228   :  { %v933_v19 = vpop.eup %932 }
 0x229   :  { %v694_v5 = vmul.f32 0.5, %v933_v19 }
 0x22b   :  { %v695_v20 = vadd.f32 0.5, %v694_v5 }
 0x22d   :  { %696 = vst [vmem:[#allocation3] sm:$0x1] %v695_v20 }
 0x22e   :  { %945 = shalt.err (!%p942_p4)
}
 0x22f   :  { %706 = dma.vmem_to_hbm [thread:$0]  %s704_s15, 16, %s1243_s9, [#allocation4]  }
 0x230   :  { %954 = dma.done.wait [#allocation4], 16  }
 0x231   :  { %955 = vsyncadd [#allocation4], 4294967280 }
 0x232   :  { %710 = vsyncpa [#allocation4], 1 }

</bundles_post_ra>
